<compile_context>
chip_gen: v6e
topology: v6e:2x2x1
jax: 0.10.0
libtpu: 0.0.40
codegen_flags: <defaults>
</compile_context>

<pallas_src>
import functools

import jax
import jax.numpy as jnp
from jax.experimental import pallas as pl
from jax.experimental.pallas import tpu as pltpu


# ----------------------------- helpers ---------------------------------------

def _round_up(n, m):
    return ((n + m - 1) // m) * m


# ----------------------------- Pallas kernel ---------------------------------

def _fused_mlp_kernel(x_ref, w_ref, b_ref, o_ref, *, activations):
    """Run the entire MLP with the activation tensor resident in VMEM/vregs.

    x_ref: (BP, D)     padded input, f32
    w_ref: (L, D, D)   stacked, zero-padded weights (in, out layout), f32
    b_ref: (L, 1, D)   stacked, zero-padded biases, f32
    o_ref: (BP, D)     padded output, f32
    """
    h = x_ref[...]  # (BP, D) f32
    for i, act in enumerate(activations):
        # Chained in-kernel matmuls: the next layer's MXU push overlaps the
        # previous drain; zero-padded weight rows kill any garbage in padded
        # lanes of h (e.g. softplus(0) != 0) before it can propagate.
        y = jnp.dot(h, w_ref[i], preferred_element_type=jnp.float32) + b_ref[i]
        if act == "lipswish":
            # 0.909 scale was folded into the following layer's weights by
            # pack_params(); only x*sigmoid(x) remains (sigmoid -> EUP slot).
            y = y * jax.nn.sigmoid(y)
        elif act == "softplus":
            y = jax.nn.softplus(y)
        elif act == "tanh":
            y = jnp.tanh(y)
        elif act == "none":
            pass
        else:
            raise ValueError(f"unknown activation: {act}")
        h = y
    o_ref[...] = h.astype(o_ref.dtype)


# ----------------------------- wrappers ---------------------------------------

def init_mlp_params(key, in_size, out_size, mlp_size, num_layers):
    """Deterministic init mimicking torch.nn.Linear defaults
    (uniform(-1/sqrt(fan_in), 1/sqrt(fan_in))). Weights stored as (in, out)."""
    dims = [(in_size, mlp_size)]
    for _ in range(num_layers - 1):
        dims.append((mlp_size, mlp_size))
    dims.append((mlp_size, out_size))

    params = []
    for (din, dout) in dims:
        key, kw, kb = jax.random.split(key, 3)
        bound = 1.0 / jnp.sqrt(jnp.float32(din))
        w = jax.random.uniform(kw, (din, dout), jnp.float32, -bound, bound)
        b = jax.random.uniform(kb, (dout,), jnp.float32, -bound, bound)
        params.append((w, b))
    return params


def pack_params(params, d_pad):
    """Zero-pad every layer's (Din, Dout) weight into a (D, D) slab and stack.

    Folds the 0.909 LipSwish scale into the weight of the layer that follows
    the LipSwish (layer index 1). This is exact because the scale is linear in
    the previous layer's output and the bias is added after the matmul.
    """
    L = len(params)
    w_stack = jnp.zeros((L, d_pad, d_pad), jnp.float32)
    b_stack = jnp.zeros((L, 1, d_pad), jnp.float32)
    for i, (w, b) in enumerate(params):
        din, dout = w.shape
        w_i = 0.909 * w if i == 1 else w
        w_stack = w_stack.at[i, :din, :dout].set(w_i)
        b_stack = b_stack.at[i, 0, :dout].set(b)
    return w_stack, b_stack


def mlp_forward(params, x, tanh):
    """Matches MLP.forward: Linear->LipSwish, (Linear->Softplus)*(L-1),
    Linear, optional Tanh — all inside a single fused Pallas kernel."""
    B, in_size = x.shape
    out_size = params[-1][0].shape[1]
    L = len(params)

    # Lane-dense feature width (multiple of 128) and sublane-aligned batch.
    D = _round_up(max(in_size, max(w.shape[1] for w, _ in params)), 128)
    BP = _round_up(B, 8)

    x_pad = jnp.zeros((BP, D), jnp.float32).at[:B, :in_size].set(x)
    w_stack, b_stack = pack_params(params, D)

    # One activation tag per linear layer.
    activations = ("lipswish",) + ("softplus",) * (L - 2) + \
                  (("tanh",) if tanh else ("none",))

    kernel = functools.partial(_fused_mlp_kernel, activations=activations)

    flops = 2 * BP * D * D * L
    transcendentals = BP * D * L
    bytes_accessed = 4 * (x_pad.size + w_stack.size + b_stack.size + BP * D)

    # Everything fits comfortably in VMEM (~0.3 MiB total) -> gridless call,
    # whole arrays resident in VMEM, no per-step grid/DMA bookkeeping.
    # TODO(synk): if batch/mlp_size are ever scaled up, add a batch grid marked
    # "parallel" and re-derive tile sizes against the v7x 64 MiB VMEM budget.
    out_pad = pl.pallas_call(
        kernel,
        out_shape=jax.ShapeDtypeStruct((BP, D), jnp.float32),
        in_specs=[
            pl.BlockSpec(memory_space=pltpu.MemorySpace.VMEM),
            pl.BlockSpec(memory_space=pltpu.MemorySpace.VMEM),
            pl.BlockSpec(memory_space=pltpu.MemorySpace.VMEM),
        ],
        out_specs=pl.BlockSpec(memory_space=pltpu.MemorySpace.VMEM),
        cost_estimate=pl.CostEstimate(
            flops=flops,
            transcendentals=transcendentals,
            bytes_accessed=bytes_accessed,
        ),
    )(x_pad, w_stack, b_stack)

    return out_pad[:B, :out_size]


# ----------------------------- main -------------------------------------------

if __name__ == "__main__":
    # Small shapes consistent with the module.
    batch = 8
    in_size = 4
    mlp_size = 32
    out_size = 3
    num_layers = 3
    tanh = True

    key = jax.random.PRNGKey(0)
    key, kx = jax.random.split(key)
    x = jax.random.normal(kx, (batch, in_size), jnp.float32)

    params = init_mlp_params(key, in_size, out_size, mlp_size, num_layers)

    out = mlp_forward(params, x, tanh)
    out = jax.block_until_ready(out)

    # Reference check in plain JAX with the ORIGINAL (unfolded, unpadded) params.
    def ref_forward(params, x):
        w, b = params[0]
        h = x @ w + b
        h = 0.909 * (h * jax.nn.sigmoid(h))          # LipSwish
        for i in range(1, len(params) - 1):
            w, b = params[i]
            h = jax.nn.softplus(h @ w + b)
        w, b = params[-1]
        h = h @ w + b
        if tanh:
            h = jnp.tanh(h)
        return h

    ref = ref_forward(params, x)
    assert out.shape == (batch, out_size)
    assert jnp.allclose(out, ref, atol=1e-5, rtol=1e-5)

    print("KERNEL_OK")
</pallas_src>

<mosaic_0001>
module attributes {stable_mosaic.version = 11 : i64} {
  func.func @_fused_mlp_kernel(%arg0: memref<8x128xf32, #tpu.memory_space<vmem>>, %arg1: memref<4x128x128xf32, #tpu.memory_space<vmem>>, %arg2: memref<4x1x128xf32, #tpu.memory_space<vmem>>, %arg3: memref<8x128xf32, #tpu.memory_space<vmem>>) attributes {dimension_semantics = [], scalar_prefetch = 0 : i64, scratch_operands = 0 : i64, tpu.core_type = #tpu.core_type<tc>} {
    %c0 = arith.constant 0 : index
    %c0_0 = arith.constant 0 : index
    %0 = vector.load %arg0[%c0, %c0_0] : memref<8x128xf32, #tpu.memory_space<vmem>>, vector<8x128xf32>
    %c0_1 = arith.constant 0 : index
    %c0_2 = arith.constant 0 : index
    %c0_3 = arith.constant 0 : index
    %1 = vector.load %arg1[%c0_1, %c0_2, %c0_3] : memref<4x128x128xf32, #tpu.memory_space<vmem>>, vector<1x128x128xf32>
    %2 = vector.shape_cast %1 : vector<1x128x128xf32> to vector<128x128xf32>
    %cst = arith.constant dense<0.000000e+00> : vector<8x128xf32>
    %3 = tpu.matmul %0, %2, %cst {dimension_numbers = #tpu.dot_dimension_numbers<[1], [0], [0], [1], [0, 0, 1, 1], [], []>} : vector<8x128xf32>, vector<128x128xf32>, vector<8x128xf32> -> vector<8x128xf32>
    %c0_4 = arith.constant 0 : index
    %c0_5 = arith.constant 0 : index
    %c0_6 = arith.constant 0 : index
    %4 = vector.load %arg2[%c0_4, %c0_5, %c0_6] : memref<4x1x128xf32, #tpu.memory_space<vmem>>, vector<1x1x128xf32>
    %5 = vector.shape_cast %4 : vector<1x1x128xf32> to vector<1x128xf32>
    %6 = vector.broadcast %5 : vector<1x128xf32> to vector<8x128xf32>
    %7 = arith.addf %3, %6 : vector<8x128xf32>
    %8 = arith.negf %7 : vector<8x128xf32>
    %9 = math.exp %8 : vector<8x128xf32>
    %cst_7 = arith.constant 1.000000e+00 : f32
    %10 = vector.broadcast %cst_7 : f32 to vector<8x128xf32>
    %11 = arith.addf %10, %9 : vector<8x128xf32>
    %12 = arith.divf %10, %11 : vector<8x128xf32>
    %13 = arith.mulf %7, %12 : vector<8x128xf32>
    %c1 = arith.constant 1 : index
    %c0_8 = arith.constant 0 : index
    %c0_9 = arith.constant 0 : index
    %14 = vector.load %arg1[%c1, %c0_8, %c0_9] : memref<4x128x128xf32, #tpu.memory_space<vmem>>, vector<1x128x128xf32>
    %15 = vector.shape_cast %14 : vector<1x128x128xf32> to vector<128x128xf32>
    %cst_10 = arith.constant dense<0.000000e+00> : vector<8x128xf32>
    %16 = tpu.matmul %13, %15, %cst_10 {dimension_numbers = #tpu.dot_dimension_numbers<[1], [0], [0], [1], [0, 0, 1, 1], [], []>} : vector<8x128xf32>, vector<128x128xf32>, vector<8x128xf32> -> vector<8x128xf32>
    %c1_11 = arith.constant 1 : index
    %c0_12 = arith.constant 0 : index
    %c0_13 = arith.constant 0 : index
    %17 = vector.load %arg2[%c1_11, %c0_12, %c0_13] : memref<4x1x128xf32, #tpu.memory_space<vmem>>, vector<1x1x128xf32>
    %18 = vector.shape_cast %17 : vector<1x1x128xf32> to vector<1x128xf32>
    %19 = vector.broadcast %18 : vector<1x128xf32> to vector<8x128xf32>
    %20 = arith.addf %16, %19 : vector<8x128xf32>
    %cst_14 = arith.constant 0.000000e+00 : f32
    %21 = vector.broadcast %cst_14 : f32 to vector<8x128xf32>
    %22 = arith.maximumf %20, %21 : vector<8x128xf32>
    %23 = vector.broadcast %cst_14 : f32 to vector<8x128xf32>
    %24 = arith.subf %20, %23 : vector<8x128xf32>
    %25 = arith.cmpf one, %24, %24 : vector<8x128xf32>
    %26 = vector.broadcast %cst_14 : f32 to vector<8x128xf32>
    %27 = arith.addf %20, %26 : vector<8x128xf32>
    %28 = math.absf %24 : vector<8x128xf32>
    %cst_15 = arith.constant 0.000000e+00 : f32
    %29 = vector.broadcast %cst_15 : f32 to vector<8x128xf32>
    %30 = arith.subf %29, %28 : vector<8x128xf32>
    %31 = math.exp %30 : vector<8x128xf32>
    %32 = math.log1p %31 : vector<8x128xf32>
    %33 = arith.addf %22, %32 : vector<8x128xf32>
    %34 = arith.select %25, %27, %33 : vector<8x128xi1>, vector<8x128xf32>
    %c2 = arith.constant 2 : index
    %c0_16 = arith.constant 0 : index
    %c0_17 = arith.constant 0 : index
    %35 = vector.load %arg1[%c2, %c0_16, %c0_17] : memref<4x128x128xf32, #tpu.memory_space<vmem>>, vector<1x128x128xf32>
    %36 = vector.shape_cast %35 : vector<1x128x128xf32> to vector<128x128xf32>
    %cst_18 = arith.constant dense<0.000000e+00> : vector<8x128xf32>
    %37 = tpu.matmul %34, %36, %cst_18 {dimension_numbers = #tpu.dot_dimension_numbers<[1], [0], [0], [1], [0, 0, 1, 1], [], []>} : vector<8x128xf32>, vector<128x128xf32>, vector<8x128xf32> -> vector<8x128xf32>
    %c2_19 = arith.constant 2 : index
    %c0_20 = arith.constant 0 : index
    %c0_21 = arith.constant 0 : index
    %38 = vector.load %arg2[%c2_19, %c0_20, %c0_21] : memref<4x1x128xf32, #tpu.memory_space<vmem>>, vector<1x1x128xf32>
    %39 = vector.shape_cast %38 : vector<1x1x128xf32> to vector<1x128xf32>
    %40 = vector.broadcast %39 : vector<1x128xf32> to vector<8x128xf32>
    %41 = arith.addf %37, %40 : vector<8x128xf32>
    %cst_22 = arith.constant 0.000000e+00 : f32
    %42 = vector.broadcast %cst_22 : f32 to vector<8x128xf32>
    %43 = arith.maximumf %41, %42 : vector<8x128xf32>
    %44 = vector.broadcast %cst_22 : f32 to vector<8x128xf32>
    %45 = arith.subf %41, %44 : vector<8x128xf32>
    %46 = arith.cmpf one, %45, %45 : vector<8x128xf32>
    %47 = vector.broadcast %cst_22 : f32 to vector<8x128xf32>
    %48 = arith.addf %41, %47 : vector<8x128xf32>
    %49 = math.absf %45 : vector<8x128xf32>
    %cst_23 = arith.constant 0.000000e+00 : f32
    %50 = vector.broadcast %cst_23 : f32 to vector<8x128xf32>
    %51 = arith.subf %50, %49 : vector<8x128xf32>
    %52 = math.exp %51 : vector<8x128xf32>
    %53 = math.log1p %52 : vector<8x128xf32>
    %54 = arith.addf %43, %53 : vector<8x128xf32>
    %55 = arith.select %46, %48, %54 : vector<8x128xi1>, vector<8x128xf32>
    %c3 = arith.constant 3 : index
    %c0_24 = arith.constant 0 : index
    %c0_25 = arith.constant 0 : index
    %56 = vector.load %arg1[%c3, %c0_24, %c0_25] : memref<4x128x128xf32, #tpu.memory_space<vmem>>, vector<1x128x128xf32>
    %57 = vector.shape_cast %56 : vector<1x128x128xf32> to vector<128x128xf32>
    %cst_26 = arith.constant dense<0.000000e+00> : vector<8x128xf32>
    %58 = tpu.matmul %55, %57, %cst_26 {dimension_numbers = #tpu.dot_dimension_numbers<[1], [0], [0], [1], [0, 0, 1, 1], [], []>} : vector<8x128xf32>, vector<128x128xf32>, vector<8x128xf32> -> vector<8x128xf32>
    %c3_27 = arith.constant 3 : index
    %c0_28 = arith.constant 0 : index
    %c0_29 = arith.constant 0 : index
    %59 = vector.load %arg2[%c3_27, %c0_28, %c0_29] : memref<4x1x128xf32, #tpu.memory_space<vmem>>, vector<1x1x128xf32>
    %60 = vector.shape_cast %59 : vector<1x1x128xf32> to vector<1x128xf32>
    %61 = vector.broadcast %60 : vector<1x128xf32> to vector<8x128xf32>
    %62 = arith.addf %58, %61 : vector<8x128xf32>
    %63 = math.tanh %62 : vector<8x128xf32>
    %c0_30 = arith.constant 0 : index
    %c0_31 = arith.constant 0 : index
    %64 = vector.load %arg3[%c0_30, %c0_31] : memref<8x128xf32, #tpu.memory_space<vmem>>, vector<8x128xf32>
    tpu.vector_store %arg3[%c0_30, %c0_31], %63 {strides = array<i32>} : memref<8x128xf32, #tpu.memory_space<vmem>>, vector<8x128xf32>,
    return
  }
}

</mosaic_0001>

<bundles_post_ra>
// kernel: tpu_custom_call.1
= control target key start
LH: loop header
LB: loop body
LE: loop exit
PB: predicated region body
PF: predicated region fallthrough
CT: control target
= control target key end

     0   :  { %8 = vsyncpa [#allocation3], 0  ;;  %s931_s0 = inlined_call_operand.hbm [shape: f32[8,128], index: 0, kind: input, shape index: {}]   ;;  %s932_s1 = inlined_call_operand.hbm [shape: f32[4,128,128], index: 1, kind: input, shape index: {}]   ;;  %s933_s2 = inlined_call_operand.hbm [shape: f32[4,1,128], index: 2, kind: input, shape index: {}]   ;;  %s934_s3 = inlined_call_operand.hbm [shape: f32[8,128], index: 3, kind: output, shape index: {}]  }
   0x1   :  { %9 = vsyncpa [#allocation6], 0 }
   0x2   :  { %10 = vsyncpa [#allocation4], 0  ;;  %s817_s12 = smov [#allocation5]  }
   0x3   :  { %s26_s13 = sshll.u32 %s817_s12, 4  ;;  %s27_s13 = int_to_ptr.vmem [resolvable:$true] %s26_s13 }
   0x4   :  { %s739_s14 = scalar_lea.vmem %s27_s13, 8192  ;;  %p744_p1 = scmp.lt.s32.totalorder %s27_s13, %s27_s13 }
   0x5   :  { %p740_p0 = scmp.ne.s32.totalorder %s27_s13, %s739_s14  ;;  %p745_p2 = scmp.lt.s32.totalorder %s739_s14, %s739_s14 }
   0x7   :  { %p746_p3 = por %p745_p2, %p744_p1 }
   0x9   :  { %p747_p4 = pnand %p746_p3, %p740_p0 }
   0xb   :  { %750 = shalt.err (!%p747_p4)
}
   0xc   :  { %s818_s15 = smov 128   ;;  %s819_s16 = smov 8  }
   0xd   :  { %32 = dma.hbm_to_vmem [thread:$0]  %s932_s1, 8192, %s27_s13, [#allocation6], %s818_s15, %s818_s15, %s819_s16  }
   0xe   :  { %s820_s19 = smov [#allocation2]   ;;  %s821_s21 = smov [#allocation7]  }
   0xf   :  { %s17_s20 = sshll.u32 %s820_s19, 4  ;;  %s38_s22 = sshll.u32 %s821_s21, 4  ;;  %s18_s20 = int_to_ptr.vmem [resolvable:$true] %s17_s20  ;;  %s39_s22 = int_to_ptr.vmem [resolvable:$true] %s38_s22 }
  0x10   :  { %s759_s23 = scalar_lea.vmem %s18_s20, 128  ;;  %p764_p6 = scmp.lt.s32.totalorder %s18_s20, %s18_s20 }
  0x11   :  { %p760_p5 = scmp.ne.s32.totalorder %s18_s20, %s759_s23  ;;  %p765_p7 = scmp.lt.s32.totalorder %s759_s23, %s759_s23 }
  0x13   :  { %p766_p8 = por %p765_p7, %p764_p6 }
  0x15   :  { %p767_p9 = pnand %p766_p8, %p760_p5 }
  0x17   :  { %770 = shalt.err (!%p767_p9)
}
  0x18   :  { %20 = dma.hbm_to_vmem [thread:$0]  %s931_s0, 128, %s18_s20, [#allocation3]  }
  0x19   :  { %s779_s26 = scalar_lea.vmem %s39_s22, 64  ;;  %p784_p11 = scmp.lt.s32.totalorder %s39_s22, %s39_s22 }
  0x1a   :  { %p780_p10 = scmp.ne.s32.totalorder %s39_s22, %s779_s26  ;;  %p785_p12 = scmp.lt.s32.totalorder %s779_s26, %s779_s26 }
  0x1c   :  { %p786_p13 = por %p785_p12, %p784_p11 }
  0x1e   :  { %p787_p0 = pnand %p786_p13, %p780_p10 }
  0x20   :  { %790 = shalt.err (!%p787_p0)
}
  0x21   :  { %s822_s1 = smov 16   ;;  %s823_s27 = smov 1  }
  0x22   :  { %44 = dma.hbm_to_vmem [thread:$0]  %s933_s2, 64, %s39_s22, [#allocation6], %s822_s1, %s822_s1, %s823_s27  }
  0x23   :  { %811 = dma.done.wait [#allocation3], 128  }
  0x24   :  { %812 = vsyncadd [#allocation3], 4294967168 }
  0x25   :  { %813 = dma.done.wait [#allocation6], 8256  }
  0x26   :  { %814 = vsyncadd [#allocation6], 4294959040  ;;  %v824_v0 = vmov 0.0   ;;  %vm825_vm0 = vmmov 0   ;;  %v70_v1 = vld [vmem:[#allocation5 + $0x78] sm:$0xff]  ;;  %v69_v2 = vld [vmem:[#allocation5 + $0x70] sm:$0xff] }
  0x27   :  { %567 = vmatprep.subr.mxu0 %v824_v0  ;;  %599 = vmatprep.mubr.msk.f32.mxu0 %vm825_vm0, %v824_v0  ;;  %v68_v3 = vld [vmem:[#allocation5 + $0x68] sm:$0xff]  ;;  %v67_v4 = vld [vmem:[#allocation5 + $0x60] sm:$0xff]  ;;  %v66_v5 = vld [vmem:[#allocation5 + $0x58] sm:$0xff]  ;;  %s826_s0 = smov [#allocation8]  }
  0x28   :  { %602 = vmatprep.subr.mxu1 %v824_v0  ;;  %634 = vmatprep.mubr.msk.f32.mxu1 %vm825_vm0, %v824_v0  ;;  %v65_v6 = vld [vmem:[#allocation5 + $0x50] sm:$0xff]  ;;  %v64_v7 = vld [vmem:[#allocation5 + $0x48] sm:$0xff]  ;;  %v63_v8 = vld [vmem:[#allocation5 + $0x40] sm:$0xff]  ;;  %s484_s2 = sshll.u32 %s826_s0, 4  ;;  %s485_s2 = int_to_ptr.vmem [resolvable:$true] %s484_s2 }
  0x29   :  { %568 = vmatpush3.msra.mxu0 %v70_v1  ;;  %v62_v9 = vld [vmem:[#allocation5 + $0x38] sm:$0xff]  ;;  %v61_v10 = vld [vmem:[#allocation5 + $0x30] sm:$0xff]  ;;  %v60_v11 = vld [vmem:[#allocation5 + $0x28] sm:$0xff]  ;;  %s791_s30 = scalar_lea.vmem %s485_s2, 128  ;;  %p796_p2 = scmp.lt.s32.totalorder %s485_s2, %s485_s2 }
  0x2a   :  { %569 = vmatprep.subr.mxu0 %v824_v0  ;;  %v59_v12 = vld [vmem:[#allocation5 + $0x20] sm:$0xff]  ;;  %v58_v13 = vld [vmem:[#allocation5 + $0x18] sm:$0xff]  ;;  %v57_v14 = vld [vmem:[#allocation5 + $0x10] sm:$0xff]  ;;  %p792_p1 = scmp.ne.s32.totalorder %s485_s2, %s791_s30  ;;  %p797_p3 = scmp.lt.s32.totalorder %s791_s30, %s791_s30 }
  0x2b   :  { %570 = vmatpush3.msra.mxu0 %v69_v2  ;;  %v56_v15 = vld [vmem:[#allocation5 + $0x8] sm:$0xff]  ;;  %v55_v16 = vld [vmem:[#allocation5] sm:$0xff]  ;;  %v54_v17 = vld [vmem:[#allocation2] sm:$0xff] }
  0x2c   :  { %571 = vmatprep.subr.mxu0 %v824_v0  ;;  %v171_v18 = vld [vmem:[#allocation5 + $0xf8] sm:$0xff]  ;;  %v170_v19 = vld [vmem:[#allocation5 + $0xf0] sm:$0xff]  ;;  %v169_v20 = vld [vmem:[#allocation5 + $0xe8] sm:$0xff]  ;;  %p798_p4 = por %p797_p3, %p796_p2 }
  0x2d   :  { %572 = vmatpush3.msra.mxu0 %v68_v3  ;;  %603 = vmatpush3.msra.mxu1 %v171_v18  ;;  %v168_v21 = vld [vmem:[#allocation5 + $0xe0] sm:$0xff]  ;;  %v167_v22 = vld [vmem:[#allocation5 + $0xd8] sm:$0xff]  ;;  %v166_v23 = vld [vmem:[#allocation5 + $0xd0] sm:$0xff] }
  0x2e   :  { %573 = vmatprep.subr.mxu0 %v824_v0  ;;  %604 = vmatprep.subr.mxu1 %v824_v0  ;;  %v165_v24 = vld [vmem:[#allocation5 + $0xc8] sm:$0xff]  ;;  %v164_v25 = vld [vmem:[#allocation5 + $0xc0] sm:$0xff]  ;;  %v163_v26 = vld [vmem:[#allocation5 + $0xb8] sm:$0xff]  ;;  %p799_p5 = pnand %p798_p4, %p792_p1 }
  0x2f   :  { %574 = vmatpush3.msra.mxu0 %v67_v4  ;;  %605 = vmatpush3.msra.mxu1 %v170_v19  ;;  %v162_v27 = vld [vmem:[#allocation5 + $0xb0] sm:$0xff]  ;;  %v161_v28 = vld [vmem:[#allocation5 + $0xa8] sm:$0xff]  ;;  %v160_v29 = vld [vmem:[#allocation5 + $0xa0] sm:$0xff] }
  0x30   :  { %575 = vmatprep.subr.mxu0 %v824_v0  ;;  %606 = vmatprep.subr.mxu1 %v824_v0  ;;  %v159_v30 = vld [vmem:[#allocation5 + $0x98] sm:$0xff]  ;;  %v158_v31 = vld [vmem:[#allocation5 + $0x90] sm:$0xff]  ;;  %v157_v32 = vld [vmem:[#allocation5 + $0x88] sm:$0xff] }
  0x31   :  { %576 = vmatpush3.msra.mxu0 %v66_v5  ;;  %607 = vmatpush3.msra.mxu1 %v169_v20  ;;  %v156_v33 = vld [vmem:[#allocation5 + $0x80] sm:$0xff]  ;;  %v284_v43 = vld [vmem:[#allocation5 + $0x178] sm:$0xff]  ;;  %v283_v44 = vld [vmem:[#allocation5 + $0x170] sm:$0xff] }
  0x32   :  { %577 = vmatprep.subr.mxu0 %v824_v0  ;;  %608 = vmatprep.subr.mxu1 %v824_v0  ;;  %v494_v34 = vld [vmem:[#allocation7] ss:$0 sm:$0xff]  ;;  %v282_v45 = vld [vmem:[#allocation5 + $0x168] sm:$0xff]  ;;  %v280_v47 = vld [vmem:[#allocation5 + $0x158] sm:$0xff] }
  0x33   :  { %578 = vmatpush3.msra.mxu0 %v65_v6  ;;  %609 = vmatpush3.msra.mxu1 %v168_v21  ;;  %v281_v46 = vld [vmem:[#allocation5 + $0x160] sm:$0xff]  ;;  %v279_v48 = vld [vmem:[#allocation5 + $0x150] sm:$0xff]  ;;  %v278_v49 = vld [vmem:[#allocation5 + $0x148] sm:$0xff] }
  0x34   :  { %579 = vmatprep.subr.mxu0 %v824_v0  ;;  %610 = vmatprep.subr.mxu1 %v824_v0  ;;  %v277_v50 = vld [vmem:[#allocation5 + $0x140] sm:$0xff]  ;;  %v276_v51 = vld [vmem:[#allocation5 + $0x138] sm:$0xff]  ;;  %v275_v52 = vld [vmem:[#allocation5 + $0x130] sm:$0xff] }
  0x35   :  { %580 = vmatpush3.msra.mxu0 %v64_v7  ;;  %611 = vmatpush3.msra.mxu1 %v167_v22  ;;  %v274_v53 = vld [vmem:[#allocation5 + $0x128] sm:$0xff]  ;;  %v273_v54 = vld [vmem:[#allocation5 + $0x120] sm:$0xff]  ;;  %v272_v55 = vld [vmem:[#allocation5 + $0x118] sm:$0xff] }
  0x36   :  { %581 = vmatprep.subr.mxu0 %v824_v0  ;;  %612 = vmatprep.subr.mxu1 %v824_v0  ;;  %v271_v56 = vld [vmem:[#allocation5 + $0x110] sm:$0xff]  ;;  %v270_v57 = vld [vmem:[#allocation5 + $0x108] sm:$0xff]  ;;  %v269_v58 = vld [vmem:[#allocation5 + $0x100] sm:$0xff] }
  0x37   :  { %582 = vmatpush3.msra.mxu0 %v63_v8  ;;  %613 = vmatpush3.msra.mxu1 %v166_v23  ;;  %v496_v59 = vld [vmem:[#allocation7 + $0x1] ss:$0 sm:$0xff]  ;;  %v393_v19 = vld [vmem:[#allocation5 + $0x1d8] sm:$0xff]  ;;  %v392_v20 = vld [vmem:[#allocation5 + $0x1d0] sm:$0xff] }
  0x38   :  { %583 = vmatprep.subr.mxu0 %v824_v0  ;;  %614 = vmatprep.subr.mxu1 %v824_v0  ;;  %v394_v18 = vld [vmem:[#allocation5 + $0x1e0] sm:$0xff]  ;;  %v391_v21 = vld [vmem:[#allocation5 + $0x1c8] sm:$0xff]  ;;  %v389_v23 = vld [vmem:[#allocation5 + $0x1b8] sm:$0xff] }
  0x39   :  { %584 = vmatpush3.msra.mxu0 %v62_v9  ;;  %615 = vmatpush3.msra.mxu1 %v165_v24  ;;  %v390_v22 = vld [vmem:[#allocation5 + $0x1c0] sm:$0xff]  ;;  %v388_v24 = vld [vmem:[#allocation5 + $0x1b0] sm:$0xff] }
  0x3a   :  { %585 = vmatprep.subr.mxu0 %v824_v0  ;;  %616 = vmatprep.subr.mxu1 %v824_v0 }
  0x3b   :  { %586 = vmatpush3.msra.mxu0 %v61_v10  ;;  %617 = vmatpush3.msra.mxu1 %v164_v25  ;;  %v387_v25 = vld [vmem:[#allocation5 + $0x1a8] sm:$0xff] }
  0x3c   :  { %587 = vmatprep.subr.mxu0 %v824_v0  ;;  %618 = vmatprep.subr.mxu1 %v824_v0 }
  0x3d   :  { %588 = vmatpush3.msra.mxu0 %v60_v11  ;;  %619 = vmatpush3.msra.mxu1 %v163_v26  ;;  %v386_v26 = vld [vmem:[#allocation5 + $0x1a0] sm:$0xff] }
  0x3e   :  { %589 = vmatprep.subr.mxu0 %v824_v0  ;;  %620 = vmatprep.subr.mxu1 %v824_v0 }
  0x3f   :  { %590 = vmatpush3.msra.mxu0 %v59_v12  ;;  %621 = vmatpush3.msra.mxu1 %v162_v27  ;;  %v385_v27 = vld [vmem:[#allocation5 + $0x198] sm:$0xff] }
  0x40   :  { %591 = vmatprep.subr.mxu0 %v824_v0  ;;  %622 = vmatprep.subr.mxu1 %v824_v0 }
  0x41   :  { %592 = vmatpush3.msra.mxu0 %v58_v13  ;;  %623 = vmatpush3.msra.mxu1 %v161_v28  ;;  %v384_v28 = vld [vmem:[#allocation5 + $0x190] sm:$0xff] }
  0x42   :  { %593 = vmatprep.subr.mxu0 %v824_v0  ;;  %624 = vmatprep.subr.mxu1 %v824_v0 }
  0x43   :  { %594 = vmatpush3.msra.mxu0 %v57_v14  ;;  %625 = vmatpush3.msra.mxu1 %v160_v29  ;;  %v383_v29 = vld [vmem:[#allocation5 + $0x188] sm:$0xff] }
  0x44   :  { %595 = vmatprep.subr.mxu0 %v824_v0  ;;  %626 = vmatprep.subr.mxu1 %v824_v0 }
  0x45   :  { %596 = vmatpush3.msra.mxu0 %v56_v15  ;;  %627 = vmatpush3.msra.mxu1 %v159_v30  ;;  %v397_v15 = vld [vmem:[#allocation5 + $0x1f8] sm:$0xff]  ;;  %v382_v30 = vld [vmem:[#allocation5 + $0x180] sm:$0xff] }
  0x46   :  { %597 = vmatprep.subr.mxu0 %v824_v0  ;;  %628 = vmatprep.subr.mxu1 %v824_v0 }
  0x47   :  { %598 = vmatpush3.msra.mxu0 %v55_v16  ;;  %629 = vmatpush3.msra.mxu1 %v158_v31  ;;  %v396_v16 = vld [vmem:[#allocation5 + $0x1f0] sm:$0xff]  ;;  %v497_v31 = vld [vmem:[#allocation7 + $0x2] ss:$0 sm:$0xff] }
  0x48   :  { %600 = vmatmul.mubr.f32.vlgmr.msra.gmra.mxu0 %v54_v17  ;;  %637 = vmatprep.subr.mxu0 %v824_v0  ;;  %v395_v17 = vld [vmem:[#allocation5 + $0x1e8] sm:$0xff] }
  0x49   :  { %669 = vmatprep.mubr.msk.f32.mxu0 %vm825_vm0, %v824_v0  ;;  %630 = vmatprep.subr.mxu1 %v824_v0 }
  0x4a   :  { %631 = vmatpush3.msra.mxu1 %v157_v32  ;;  %638 = vmatpush3.msra.mxu0 %v284_v43 }
  0x4b   :  { %632 = vmatprep.subr.mxu1 %v824_v0  ;;  %639 = vmatprep.subr.mxu0 %v824_v0 }
  0x4c   :  { %633 = vmatpush3.msra.mxu1 %v156_v33  ;;  %640 = vmatpush3.msra.mxu0 %v283_v44 }
  0x4d   :  { %672 = vmatprep.subr.mxu1 %v824_v0  ;;  %641 = vmatprep.subr.mxu0 %v824_v0 }
  0x4e   :  { %642 = vmatpush3.msra.mxu0 %v282_v45 }
  0x4f   :  { %643 = vmatprep.subr.mxu0 %v824_v0 }
  0x50   :  { %644 = vmatpush3.msra.mxu0 %v281_v46 }
  0x51   :  { %645 = vmatprep.subr.mxu0 %v824_v0 }
  0x52   :  { %646 = vmatpush3.msra.mxu0 %v280_v47 }
  0x53   :  { %647 = vmatprep.subr.mxu0 %v824_v0 }
  0x54   :  { %648 = vmatpush3.msra.mxu0 %v279_v48 }
  0x55   :  { %649 = vmatprep.subr.mxu0 %v824_v0 }
  0x56   :  { %650 = vmatpush3.msra.mxu0 %v278_v49  ;;  %v498_v49 = vld [vmem:[#allocation7 + $0x3] ss:$0 sm:$0xff] }
  0x57   :  { %651 = vmatprep.subr.mxu0 %v824_v0 }
  0x58   :  { %652 = vmatpush3.msra.mxu0 %v277_v50 }
  0x59   :  { %653 = vmatprep.subr.mxu0 %v824_v0 }
  0x5a   :  { %654 = vmatpush3.msra.mxu0 %v276_v51 }
  0x5b   :  { %655 = vmatprep.subr.mxu0 %v824_v0 }
  0x5c   :  { %656 = vmatpush3.msra.mxu0 %v275_v52 }
  0x5d   :  { %657 = vmatprep.subr.mxu0 %v824_v0 }
  0x5e   :  { %658 = vmatpush3.msra.mxu0 %v274_v53 }
  0x5f   :  { %659 = vmatprep.subr.mxu0 %v824_v0 }
  0x60   :  { %660 = vmatpush3.msra.mxu0 %v273_v54 }
  0x61   :  { %661 = vmatprep.subr.mxu0 %v824_v0 }
  0x62   :  { %662 = vmatpush3.msra.mxu0 %v272_v55 }
  0x63   :  { %663 = vmatprep.subr.mxu0 %v824_v0 }
  0x64   :  { %664 = vmatpush3.msra.mxu0 %v271_v56 }
  0x65   :  { %665 = vmatprep.subr.mxu0 %v824_v0 }
  0x66   :  { %666 = vmatpush3.msra.mxu0 %v270_v57 }
  0x67   :  { %667 = vmatprep.subr.mxu0 %v824_v0 }
  0x68   :  { %668 = vmatpush3.msra.mxu0 %v269_v58 }
 0x108   :  { %v144_v35 = vpop.f32.mrf.mxu0 }
 0x109   :  { %v145_v36 = vadd.f32 %v494_v34, %v144_v35 }
 0x10a   :  { %v601_v37 = vpop.f32.mrf.mxu0 }
 0x10b   :  { %v495_v38 = vmul.f32 -1.442695, %v145_v36 }
 0x10d   :  { %717 = vpow2.f32 %v495_v38 }
 0x11a   :  { %v718_v39 = vpop.eup %717 }
 0x11b   :  { %v151_v40 = vadd.f32 1.0, %v718_v39 }
 0x11d   :  { %719 = vrcp.f32 %v151_v40 }
 0x12a   :  { %v720_v41 = vpop.eup %719 }
 0x12b   :  { %v154_v42 = vmul.f32 %v720_v41, %v145_v36 }
 0x12d   :  { %635 = vmatmul.mubr.f32.vlgmr.msra.gmra.mxu1 %v154_v42 }
 0x12e   :  { %704 = vmatprep.mubr.msk.f32.mxu1 %vm825_vm0, %v824_v0  ;;  %673 = vmatpush3.msra.mxu1 %v397_v15 }
 0x12f   :  { %674 = vmatprep.subr.mxu1 %v824_v0 }
 0x130   :  { %675 = vmatpush3.msra.mxu1 %v396_v16 }
 0x131   :  { %676 = vmatprep.subr.mxu1 %v824_v0 }
 0x132   :  { %677 = vmatpush3.msra.mxu1 %v395_v17 }
 0x133   :  { %678 = vmatprep.subr.mxu1 %v824_v0 }
 0x134   :  { %679 = vmatpush3.msra.mxu1 %v394_v18 }
 0x135   :  { %680 = vmatprep.subr.mxu1 %v824_v0 }
 0x136   :  { %681 = vmatpush3.msra.mxu1 %v393_v19 }
 0x137   :  { %682 = vmatprep.subr.mxu1 %v824_v0 }
 0x138   :  { %683 = vmatpush3.msra.mxu1 %v392_v20 }
 0x139   :  { %684 = vmatprep.subr.mxu1 %v824_v0 }
 0x13a   :  { %685 = vmatpush3.msra.mxu1 %v391_v21 }
 0x13b   :  { %686 = vmatprep.subr.mxu1 %v824_v0 }
 0x13c   :  { %687 = vmatpush3.msra.mxu1 %v390_v22 }
 0x13d   :  { %688 = vmatprep.subr.mxu1 %v824_v0 }
 0x13e   :  { %689 = vmatpush3.msra.mxu1 %v389_v23 }
 0x13f   :  { %690 = vmatprep.subr.mxu1 %v824_v0 }
 0x140   :  { %691 = vmatpush3.msra.mxu1 %v388_v24 }
 0x141   :  { %692 = vmatprep.subr.mxu1 %v824_v0 }
 0x142   :  { %693 = vmatpush3.msra.mxu1 %v387_v25 }
 0x143   :  { %694 = vmatprep.subr.mxu1 %v824_v0 }
 0x144   :  { %695 = vmatpush3.msra.mxu1 %v386_v26 }
 0x145   :  { %696 = vmatprep.subr.mxu1 %v824_v0 }
 0x146   :  { %697 = vmatpush3.msra.mxu1 %v385_v27 }
 0x147   :  { %698 = vmatprep.subr.mxu1 %v824_v0 }
 0x148   :  { %699 = vmatpush3.msra.mxu1 %v384_v28 }
 0x149   :  { %700 = vmatprep.subr.mxu1 %v824_v0 }
 0x14a   :  { %701 = vmatpush3.msra.mxu1 %v383_v29 }
 0x14b   :  { %702 = vmatprep.subr.mxu1 %v824_v0 }
 0x14c   :  { %703 = vmatpush3.msra.mxu1 %v382_v30 }
 0x1ed   :  { %v246_v60 = vpop.f32.mrf.mxu1 }
 0x1ee   :  { %v247_v61 = vadd.f32 %v496_v59, %v246_v60 }
 0x1ef   :  { %v636_v62 = vpop.f32.mrf.mxu1 }
 0x1f0   :  { %v253_v63 = vand.u32 2147483647, %v247_v61  ;;  %v250_v11 = vmax.f32 %v247_v61, 0.0  ;;  %vm251_vm2 = vcmp.ne.f32.partialorder %v247_v61, %v247_v61 }
 0x1f2   :  { %v254_v1 = vsub.f32 0.0, %v253_v63 }
 0x1f4   :  { %v255_v2 = vmul.f32 1.442695, %v254_v1 }
 0x1f6   :  { %721 = vpow2.f32 %v255_v2 }
 0x203   :  { %v722_v3 = vpop.eup %721 }
 0x204   :  { %v257_v4 = vadd.f32 1.0, %v722_v3  ;;  %v260_v5 = vmul.f32 -0.5, %v722_v3  ;;  %v263_v7 = vand.u32 2147483647, %v722_v3 }
 0x206   :  { %723 = vlog2.f32 %v257_v4  ;;  %v261_v6 = vadd.f32 1.0, %v260_v5  ;;  %vm264_vm1 = vcmp.lt.f32.partialorder %v263_v7, 0.0004427343 }
 0x208   :  { %v262_v10 = vmul.f32 %v722_v3, %v261_v6 }
 0x213   :  { %v724_v8 = vpop.eup %723 }
 0x214   :  { %v259_v9 = vmul.f32 0.6931472, %v724_v8 }
 0x216   :  { %v265_v12 = vsel %vm264_vm1, %v262_v10, %v259_v9 }
 0x217   :  { %v266_v13 = vadd.f32 %v265_v12, %v250_v11 }
 0x219   :  { %v267_v14 = vsel %vm251_vm2, %v247_v61, %v266_v13 }
 0x21a   :  { %670 = vmatmul.mubr.f32.vlgmr.msra.gmra.mxu0 %v267_v14 }
 0x2da   :  { %v359_v32 = vpop.f32.mrf.mxu0 }
 0x2db   :  { %v360_v33 = vadd.f32 %v497_v31, %v359_v32 }
 0x2dc   :  { %v671_v34 = vpop.f32.mrf.mxu0 }
 0x2dd   :  { %v366_v35 = vand.u32 2147483647, %v360_v33  ;;  %v363_v46 = vmax.f32 %v360_v33, 0.0  ;;  %vm364_vm4 = vcmp.ne.f32.partialorder %v360_v33, %v360_v33 }
 0x2df   :  { %v367_v36 = vsub.f32 0.0, %v366_v35 }
 0x2e1   :  { %v368_v37 = vmul.f32 1.442695, %v367_v36 }
 0x2e3   :  { %725 = vpow2.f32 %v368_v37 }
 0x2f0   :  { %v726_v38 = vpop.eup %725 }
 0x2f1   :  { %v370_v39 = vadd.f32 1.0, %v726_v38  ;;  %v373_v40 = vmul.f32 -0.5, %v726_v38  ;;  %v376_v42 = vand.u32 2147483647, %v726_v38 }
 0x2f3   :  { %727 = vlog2.f32 %v370_v39  ;;  %v374_v41 = vadd.f32 1.0, %v373_v40  ;;  %vm377_vm3 = vcmp.lt.f32.partialorder %v376_v42, 0.0004427343 }
 0x2f5   :  { %v375_v45 = vmul.f32 %v726_v38, %v374_v41 }
 0x300   :  { %v728_v43 = vpop.eup %727 }
 0x301   :  { %v372_v44 = vmul.f32 0.6931472, %v728_v43 }
 0x303   :  { %v378_v0 = vsel %vm377_vm3, %v375_v45, %v372_v44 }
 0x304   :  { %v379_v47 = vadd.f32 %v378_v0, %v363_v46 }
 0x306   :  { %v380_v48 = vsel %vm364_vm4, %v360_v33, %v379_v47 }
 0x307   :  { %705 = vmatmul.mubr.f32.vlgmr.msra.gmra.mxu1 %v380_v48 }
 0x3c7   :  { %v472_v50 = vpop.f32.mrf.mxu1 }
 0x3c8   :  { %v473_v51 = vadd.f32 %v498_v49, %v472_v50 }
 0x3c9   :  { %v706_v52 = vpop.f32.mrf.mxu1 }
 0x3ca   :  { %729 = vtanh.f32 %v473_v51 }
 0x3d7   :  { %v730_v53 = vpop.eup %729 }
 0x3d8   :  { %477 = vst [vmem:[#allocation8] sm:$0xff] %v730_v53 }
 0x3d9   :  { %802 = shalt.err (!%p799_p5)
}
 0x3da   :  { %487 = dma.vmem_to_hbm [thread:$0]  %s485_s2, 128, %s934_s3, [#allocation4]  }
 0x3db   :  { %815 = dma.done.wait [#allocation4], 128  }
 0x3dc   :  { %816 = vsyncadd [#allocation4], 4294967168 }
 0x3dd   :  { %491 = vsyncpa [#allocation3], 1 }
 0x3de   :  { %492 = vsyncpa [#allocation6], 1 }
 0x3df   :  { %493 = vsyncpa [#allocation4], 1 }

</bundles_post_ra>
